<compile_context>
chip_gen: v7x
topology: tpu7x:2x2x1
jax: 0.10.0
libtpu: 0.0.40
codegen_flags: <defaults>
</compile_context>

<pallas_src>
import jax
import jax.numpy as jnp
from jax.experimental import pallas as pl
from jax.experimental.pallas import tpu as pltpu

K_IN = 28 * 28      # 784 (nn.Flatten output)
H1 = 512
H2 = 256
N_OUT = 10
N_PAD = 128         # lane-dense output (unmasked vst), sliced back to 10 on host


def mlp_kernel(x_ref, w1_ref, b1_ref, w2_ref, b2_ref, w3_ref, b3_ref, o_ref):
    # x arrives as f32 straight from HBM; cast to bf16 right at the MXU feed (no
    # host-side pad/cast materialization). Accumulate in f32; bias add + ReLU in f32
    # (keeps v5e's non-bf16 VPU happy).
    x = x_ref[...].astype(jnp.bfloat16)

    h1 = jnp.dot(x, w1_ref[...], preferred_element_type=jnp.float32) + b1_ref[...]
    h1 = jnp.maximum(h1, 0.0)

    h2 = jnp.dot(h1.astype(jnp.bfloat16), w2_ref[...],
                 preferred_element_type=jnp.float32) + b2_ref[...]
    h2 = jnp.maximum(h2, 0.0)

    h3 = jnp.dot(h2.astype(jnp.bfloat16), w3_ref[...],
                 preferred_element_type=jnp.float32) + b3_ref[...]
    h3 = jnp.maximum(h3, 0.0)   # final ReLU is part of MyNet's net_stack

    o_ref[...] = h3.astype(o_ref.dtype)   # bf16 writeback, lane-dense (tb, 128)


def prepare_params(params):
    """Cast/pad the f32 master params once; keep these persistent in a serving loop."""
    w1, b1, w2, b2, w3, b3 = params
    w1p = w1.astype(jnp.bfloat16)                                   # (784, 512)
    w2p = w2.astype(jnp.bfloat16)                                   # (512, 256)
    w3p = jnp.zeros((H2, N_PAD), jnp.bfloat16).at[:, :N_OUT].set(
        w3.astype(jnp.bfloat16))                                    # (256, 128)
    b1p = b1.reshape(1, H1).astype(jnp.float32)
    b2p = b2.reshape(1, H2).astype(jnp.float32)
    b3p = jnp.zeros((1, N_PAD), jnp.float32).at[:, :N_OUT].set(
        b3.reshape(1, N_OUT).astype(jnp.float32))
    return (w1p, b1p, w2p, b2p, w3p, b3p)


def _choose_batch_tile(B):
    # bf16 packs two rows per sublane -> batch tiles are multiples of 16.
    b16 = max(16, ((B + 15) // 16) * 16)
    if B < 32:
        return b16                      # single small tile; splitting adds overhead
    # Guarantee >=2 grid steps (so both v7x TensorCores get work via the "parallel"
    # axis) and cap at 512 so the ~0.35us per-step overhead is well amortized against
    # per-step MXU time while staying far under the scoped-VMEM limit.
    half = ((b16 // 2 + 15) // 16) * 16
    return min(512, half)


@jax.jit
def mynet_forward(x_nchw, prepared):
    w1p, b1p, w2p, b2p, w3p, b3p = prepared
    B = x_nchw.shape[0]

    # nn.Flatten: (B, C, H, W) -> (B, C*H*W), row-major (matches torch).
    x = x_nchw.reshape(B, K_IN).astype(jnp.float32)

    tb = _choose_batch_tile(B)
    b_pad = pl.cdiv(B, tb) * tb
    if b_pad != B:
        # Pad only the batch dim; the (tb, 784) block keeps the full last dim, so no
        # host-side K-padding / bf16 copy of x is ever materialized.
        x = jnp.pad(x, ((0, b_pad - B), (0, 0)))

    resident = lambda i: (0, 0)   # weights/biases stay VMEM-resident across batch tiles
    out_pad = pl.pallas_call(
        mlp_kernel,
        out_shape=jax.ShapeDtypeStruct((b_pad, N_PAD), jnp.bfloat16),
        grid=(b_pad // tb,),
        in_specs=[
            pl.BlockSpec((tb, K_IN), lambda i: (i, 0)),   # 784 == full array dim: legal
            pl.BlockSpec((K_IN, H1), resident),
            pl.BlockSpec((1, H1), resident),
            pl.BlockSpec((H1, H2), resident),
            pl.BlockSpec((1, H2), resident),
            pl.BlockSpec((H2, N_PAD), resident),
            pl.BlockSpec((1, N_PAD), resident),
        ],
        out_specs=pl.BlockSpec((tb, N_PAD), lambda i: (i, 0)),
        compiler_params=pltpu.CompilerParams(
            dimension_semantics=("parallel",)),
    )(x, w1p, b1p, w2p, b2p, w3p, b3p)

    # Padded batch rows hold ReLU(bias) garbage; slice them (and the N padding) off.
    return out_pad[:B, :N_OUT].astype(jnp.float32)


def mynet_reference(x_nchw, params):
    """Pure-JAX f32 reference (mirrors the torch forward exactly)."""
    w1, b1, w2, b2, w3, b3 = params
    x = x_nchw.reshape(x_nchw.shape[0], -1)
    h = jnp.maximum(x @ w1 + b1, 0.0)
    h = jnp.maximum(h @ w2 + b2, 0.0)
    return jnp.maximum(h @ w3 + b3, 0.0)


def init_params(key):
    # Mimics torch Linear default init bounds: U[-1/sqrt(fan_in), 1/sqrt(fan_in)].
    dims = [(K_IN, H1), (H1, H2), (H2, N_OUT)]
    params = []
    for fan_in, fan_out in dims:
        kw, kb, key = jax.random.split(key, 3)
        bound = 1.0 / jnp.sqrt(fan_in)
        w = jax.random.uniform(kw, (fan_in, fan_out), jnp.float32, -bound, bound)
        b = jax.random.uniform(kb, (fan_out,), jnp.float32, -bound, bound)
        params += [w, b]
    return params


if __name__ == "__main__":
    key = jax.random.PRNGKey(0)
    kx, kx2, kp = jax.random.split(key, 3)

    params = init_params(kp)
    prepared = prepare_params(params)   # persistent bf16 weights / f32 biases

    # Small serving-style batch.
    B = 8
    x = jax.random.normal(kx, (B, 1, 28, 28), dtype=jnp.float32)
    y = jax.block_until_ready(mynet_forward(x, prepared))
    assert y.shape == (B, N_OUT)
    assert bool(jnp.all(y >= 0.0))      # final ReLU (present in the torch spec)
    y_ref = mynet_reference(x, params)
    err = float(jnp.max(jnp.abs(y - y_ref)))
    assert err < 0.1, f"B={B}: max abs error vs f32 reference too large: {err}"

    # Batch that exercises the multi-tile grid (grid=2) and batch-padding path.
    B2 = 40
    x2 = jax.random.normal(kx2, (B2, 1, 28, 28), dtype=jnp.float32)
    y2 = jax.block_until_ready(mynet_forward(x2, prepared))
    assert y2.shape == (B2, N_OUT)
    y2_ref = mynet_reference(x2, params)
    err2 = float(jnp.max(jnp.abs(y2 - y2_ref)))
    assert err2 < 0.1, f"B={B2}: max abs error vs f32 reference too large: {err2}"

    print("KERNEL_OK")
</pallas_src>

<mosaic_0001>
module attributes {stable_mosaic.version = 11 : i64} {
  func.func @mlp_kernel(%arg0: i32, %arg1: memref<16x784xf32, #tpu.memory_space<vmem>>, %arg2: memref<784x512xbf16, #tpu.memory_space<vmem>>, %arg3: memref<1x512xf32, #tpu.memory_space<vmem>>, %arg4: memref<512x256xbf16, #tpu.memory_space<vmem>>, %arg5: memref<1x256xf32, #tpu.memory_space<vmem>>, %arg6: memref<256x128xbf16, #tpu.memory_space<vmem>>, %arg7: memref<1x128xf32, #tpu.memory_space<vmem>>, %arg8: memref<16x128xbf16, #tpu.memory_space<vmem>>) attributes {dimension_semantics = [#tpu.dimension_semantics<parallel>], iteration_bounds = array<i64: 1>, scalar_prefetch = 0 : i64, scratch_operands = 0 : i64, tpu.core_type = #tpu.core_type<tc>, window_params = [{transform_indices = @transform_0, window_bounds = array<i64: 16, 784>}, {pipeline_mode = #tpu.pipeline_mode<synchronous>, transform_indices = @transform_1, window_bounds = array<i64: 784, 512>}, {pipeline_mode = #tpu.pipeline_mode<synchronous>, transform_indices = @transform_2, window_bounds = array<i64: 1, 512>}, {pipeline_mode = #tpu.pipeline_mode<synchronous>, transform_indices = @transform_3, window_bounds = array<i64: 512, 256>}, {pipeline_mode = #tpu.pipeline_mode<synchronous>, transform_indices = @transform_4, window_bounds = array<i64: 1, 256>}, {pipeline_mode = #tpu.pipeline_mode<synchronous>, transform_indices = @transform_5, window_bounds = array<i64: 256, 128>}, {pipeline_mode = #tpu.pipeline_mode<synchronous>, transform_indices = @transform_6, window_bounds = array<i64: 1, 128>}, {transform_indices = @transform_7, window_bounds = array<i64: 16, 128>}]} {
    %c0 = arith.constant 0 : index
    %c0_0 = arith.constant 0 : index
    %0 = vector.load %arg1[%c0, %c0_0] : memref<16x784xf32, #tpu.memory_space<vmem>>, vector<16x784xf32>
    %1 = arith.truncf %0 : vector<16x784xf32> to vector<16x784xbf16>
    %c0_1 = arith.constant 0 : index
    %c0_2 = arith.constant 0 : index
    %2 = vector.load %arg2[%c0_1, %c0_2] : memref<784x512xbf16, #tpu.memory_space<vmem>>, vector<784x512xbf16>
    %cst = arith.constant dense<0.000000e+00> : vector<16x512xf32>
    %3 = tpu.matmul %1, %2, %cst {dimension_numbers = #tpu.dot_dimension_numbers<[1], [0], [0], [1], [0, 0, 1, 1], [], []>} : vector<16x784xbf16>, vector<784x512xbf16>, vector<16x512xf32> -> vector<16x512xf32>
    %c0_3 = arith.constant 0 : index
    %c0_4 = arith.constant 0 : index
    %4 = vector.load %arg3[%c0_3, %c0_4] : memref<1x512xf32, #tpu.memory_space<vmem>>, vector<1x512xf32>
    %5 = vector.broadcast %4 : vector<1x512xf32> to vector<16x512xf32>
    %6 = arith.addf %3, %5 : vector<16x512xf32>
    %cst_5 = arith.constant 0.000000e+00 : f32
    %7 = vector.broadcast %cst_5 : f32 to vector<16x512xf32>
    %8 = arith.maximumf %6, %7 : vector<16x512xf32>
    %9 = arith.truncf %8 : vector<16x512xf32> to vector<16x512xbf16>
    %c0_6 = arith.constant 0 : index
    %c0_7 = arith.constant 0 : index
    %10 = vector.load %arg4[%c0_6, %c0_7] : memref<512x256xbf16, #tpu.memory_space<vmem>>, vector<512x256xbf16>
    %cst_8 = arith.constant dense<0.000000e+00> : vector<16x256xf32>
    %11 = tpu.matmul %9, %10, %cst_8 {dimension_numbers = #tpu.dot_dimension_numbers<[1], [0], [0], [1], [0, 0, 1, 1], [], []>} : vector<16x512xbf16>, vector<512x256xbf16>, vector<16x256xf32> -> vector<16x256xf32>
    %c0_9 = arith.constant 0 : index
    %c0_10 = arith.constant 0 : index
    %12 = vector.load %arg5[%c0_9, %c0_10] : memref<1x256xf32, #tpu.memory_space<vmem>>, vector<1x256xf32>
    %13 = vector.broadcast %12 : vector<1x256xf32> to vector<16x256xf32>
    %14 = arith.addf %11, %13 : vector<16x256xf32>
    %cst_11 = arith.constant 0.000000e+00 : f32
    %15 = vector.broadcast %cst_11 : f32 to vector<16x256xf32>
    %16 = arith.maximumf %14, %15 : vector<16x256xf32>
    %17 = arith.truncf %16 : vector<16x256xf32> to vector<16x256xbf16>
    %c0_12 = arith.constant 0 : index
    %c0_13 = arith.constant 0 : index
    %18 = vector.load %arg6[%c0_12, %c0_13] : memref<256x128xbf16, #tpu.memory_space<vmem>>, vector<256x128xbf16>
    %cst_14 = arith.constant dense<0.000000e+00> : vector<16x128xf32>
    %19 = tpu.matmul %17, %18, %cst_14 {dimension_numbers = #tpu.dot_dimension_numbers<[1], [0], [0], [1], [0, 0, 1, 1], [], []>} : vector<16x256xbf16>, vector<256x128xbf16>, vector<16x128xf32> -> vector<16x128xf32>
    %c0_15 = arith.constant 0 : index
    %c0_16 = arith.constant 0 : index
    %20 = vector.load %arg7[%c0_15, %c0_16] : memref<1x128xf32, #tpu.memory_space<vmem>>, vector<1x128xf32>
    %21 = vector.broadcast %20 : vector<1x128xf32> to vector<16x128xf32>
    %22 = arith.addf %19, %21 : vector<16x128xf32>
    %cst_17 = arith.constant 0.000000e+00 : f32
    %23 = vector.broadcast %cst_17 : f32 to vector<16x128xf32>
    %24 = arith.maximumf %22, %23 : vector<16x128xf32>
    %25 = arith.truncf %24 : vector<16x128xf32> to vector<16x128xbf16>
    %c0_18 = arith.constant 0 : index
    %c0_19 = arith.constant 0 : index
    %26 = vector.load %arg8[%c0_18, %c0_19] : memref<16x128xbf16, #tpu.memory_space<vmem>>, vector<16x128xbf16>
    tpu.vector_store %arg8[%c0_18, %c0_19], %25 {strides = array<i32>} : memref<16x128xbf16, #tpu.memory_space<vmem>>, vector<16x128xbf16>,
    return
  }
  func.func @transform_0(%arg0: i32) -> (i32, i32) {
    %c0_i32 = arith.constant 0 : i32
    %c0_i32_0 = arith.constant 0 : i32
    return %arg0, %c0_i32 : i32, i32
  }
  func.func @transform_1(%arg0: i32) -> (i32, i32) {
    %c0_i32 = arith.constant 0 : i32
    %c0_i32_0 = arith.constant 0 : i32
    %c0_i32_1 = arith.constant 0 : i32
    return %c0_i32, %c0_i32_0 : i32, i32
  }
  func.func @transform_2(%arg0: i32) -> (i32, i32) {
    %c0_i32 = arith.constant 0 : i32
    %c0_i32_0 = arith.constant 0 : i32
    %c0_i32_1 = arith.constant 0 : i32
    return %c0_i32, %c0_i32_0 : i32, i32
  }
  func.func @transform_3(%arg0: i32) -> (i32, i32) {
    %c0_i32 = arith.constant 0 : i32
    %c0_i32_0 = arith.constant 0 : i32
    %c0_i32_1 = arith.constant 0 : i32
    return %c0_i32, %c0_i32_0 : i32, i32
  }
  func.func @transform_4(%arg0: i32) -> (i32, i32) {
    %c0_i32 = arith.constant 0 : i32
    %c0_i32_0 = arith.constant 0 : i32
    %c0_i32_1 = arith.constant 0 : i32
    return %c0_i32, %c0_i32_0 : i32, i32
  }
  func.func @transform_5(%arg0: i32) -> (i32, i32) {
    %c0_i32 = arith.constant 0 : i32
    %c0_i32_0 = arith.constant 0 : i32
    %c0_i32_1 = arith.constant 0 : i32
    return %c0_i32, %c0_i32_0 : i32, i32
  }
  func.func @transform_6(%arg0: i32) -> (i32, i32) {
    %c0_i32 = arith.constant 0 : i32
    %c0_i32_0 = arith.constant 0 : i32
    %c0_i32_1 = arith.constant 0 : i32
    return %c0_i32, %c0_i32_0 : i32, i32
  }
  func.func @transform_7(%arg0: i32) -> (i32, i32) {
    %c0_i32 = arith.constant 0 : i32
    %c0_i32_0 = arith.constant 0 : i32
    return %arg0, %c0_i32 : i32, i32
  }
}

</mosaic_0001>

<bundles_post_ra>
// kernel: mynet_forward.1
= control target key start
LH: loop header
LB: loop body
LE: loop exit
PB: predicated region body
PF: predicated region fallthrough
CT: control target
= control target key end

     0   :  { %12 = vsyncpa [#allocation3], 0  ;;  %s3085_s24 = smov [#allocation2]   ;;  %s3491_s0 = inlined_call_operand.vmem [shape: f32[16,784], index: 0, kind: input, shape index: {}]   ;;  %s3492_s1 = inlined_call_operand.hbm [shape: bf16[784,512], index: 1, kind: input, shape index: {}]   ;;  %s3493_s2 = inlined_call_operand.vmem [shape: f32[1,512], index: 2, kind: input, shape index: {}]   ;;  %s3494_s3 = inlined_call_operand.vmem [shape: bf16[512,256], index: 3, kind: input, shape index: {}]   ;;  %s3495_s4 = inlined_call_operand.vmem [shape: f32[1,256], index: 4, kind: input, shape index: {}]   ;;  %s3496_s5 = inlined_call_operand.vmem [shape: bf16[256,128], index: 5, kind: input, shape index: {}]   ;;  %s3497_s6 = inlined_call_operand.vmem [shape: f32[1,128], index: 6, kind: input, shape index: {}]   ;;  %s3498_s7 = inlined_call_operand.vmem [shape: bf16[16,128], index: 7, kind: output, shape index: {}]  }
   0x1   :  { %s20_s25 = sshll.u32 %s3085_s24, 4  ;;  %s3061_s28 = scalar_lea.hbm %s3492_s1, 25088  ;;  %s21_s25 = int_to_ptr.vmem [resolvable:$true] %s20_s25 }
   0x2   :  { %p3062_p0 = scmp.ne.s32.totalorder %s3492_s1, %s3061_s28  ;;  %p3065_p1 = scmp.lt.u32.totalorder %s3061_s28, %s3492_s1 }
   0x4   :  { %p3067_p2 = pnand %p3065_p1, %p3062_p0 }
   0x6   :  { %3070 = shalt.err (!%p3067_p2)
}
   0x7   :  { %s3071_s10 = scalar_lea.vmem %s21_s25, 25088  ;;  %p3076_p4 = scmp.lt.s32.totalorder %s21_s25, %s21_s25 }
   0x8   :  { %p3072_p3 = scmp.ne.s32.totalorder %s21_s25, %s3071_s10  ;;  %p3077_p5 = scmp.lt.s32.totalorder %s3071_s10, %s3071_s10 }
   0xa   :  { %p3078_p6 = por %p3077_p5, %p3076_p4 }
   0xc   :  { %p3079_p7 = pnand %p3078_p6, %p3072_p3 }
   0xe   :  { %3082 = shalt.err (!%p3079_p7)
}
   0xf   :  { %s3086_s11 = smov 256   ;;  %s3087_s12 = smov 16  }
  0x10   :  { %26 = dma.hbm_to_vmem [thread:$0]  %s3492_s1, 25088, %s21_s25, [#allocation3], %s3086_s11, %s3086_s11, %s3087_s12  }
  0x11   :  { %3083 = dma.done.wait [#allocation3], 25088  }
  0x12   :  { %3084 = vsyncadd [#allocation3], 4294942208  ;;  %v2655_v0 = vld [vmem:[#allocation2 + $0x4] ss:$16 sps:$4 sm:$0xff]   ;;  %v2659_v2 = vld [vmem:[#allocation2] ss:$16 sps:$4 sm:$0xff]  }
  0x13   :  { %v2657_v1 = vld [vmem:[#allocation2 + $0x204] ss:$16 sps:$4 sm:$0xff]   ;;  %1264 = vmatprep.subr.bf16.mxu1 %v2655_v0  ;;  %v2660_v3 = vld [vmem:[#allocation2 + $0x200] ss:$16 sps:$4 sm:$0xff]   ;;  %v42_v46 = vld [vmem:[%s3491_s0 + $0x8] sm:$0xff]  ;;  %vm1260_vm0 = vcmask 130048  }
  0x14   :  { %1307 = vmatprep.subr.bf16.mxu0 %v2657_v1  ;;  %v2661_v4 = vld [vmem:[#allocation2 + $0x24] ss:$16 sps:$4 sm:$0xff]   ;;  %1265 = vmatpush1.bf16.msra.mxu1 %v2659_v2  ;;  %v2665_v6 = vld [vmem:[#allocation2 + $0x20] ss:$16 sps:$4 sm:$0xff]   ;;  %v44_v51 = vld [vmem:[%s3491_s0 + $0x18] sm:$0xff] }
  0x15   :  { %1308 = vmatpush1.bf16.msra.mxu0 %v2660_v3  ;;  %v2663_v5 = vld [vmem:[#allocation2 + $0x224] ss:$16 sps:$4 sm:$0xff]   ;;  %1266 = vmatprep.subr.bf16.mxu1 %v2661_v4  ;;  %v2666_v7 = vld [vmem:[#allocation2 + $0x220] ss:$16 sps:$4 sm:$0xff]  }
  0x16   :  { %1309 = vmatprep.subr.bf16.mxu0 %v2663_v5  ;;  %v2667_v8 = vld [vmem:[#allocation2 + $0x44] ss:$16 sps:$4 sm:$0xff]   ;;  %v2671_v10 = vld [vmem:[#allocation2 + $0x40] ss:$16 sps:$4 sm:$0xff]  }
  0x17   :  { %v2669_v9 = vld [vmem:[#allocation2 + $0x244] ss:$16 sps:$4 sm:$0xff]   ;;  %v2672_v11 = vld [vmem:[#allocation2 + $0x240] ss:$16 sps:$4 sm:$0xff]  }
  0x18   :  { %1267 = vmatpush1.bf16.msra.mxu1 %v2665_v6  ;;  %v2673_v12 = vld [vmem:[#allocation2 + $0x64] ss:$16 sps:$4 sm:$0xff]   ;;  %v2677_v14 = vld [vmem:[#allocation2 + $0x60] ss:$16 sps:$4 sm:$0xff]  }
  0x19   :  { %1310 = vmatpush1.bf16.msra.mxu0 %v2666_v7  ;;  %1268 = vmatprep.subr.bf16.mxu1 %v2667_v8  ;;  %v2675_v13 = vld [vmem:[#allocation2 + $0x264] ss:$16 sps:$4 sm:$0xff]   ;;  %v2678_v15 = vld [vmem:[#allocation2 + $0x260] ss:$16 sps:$4 sm:$0xff]   ;;  %v48_v7 = vld [vmem:[%s3491_s0 + $0x38] sm:$0xff] }
  0x1a   :  { %1311 = vmatprep.subr.bf16.mxu0 %v2669_v9  ;;  %v2679_v16 = vld [vmem:[#allocation2 + $0x84] ss:$16 sps:$4 sm:$0xff]   ;;  %v2683_v18 = vld [vmem:[#allocation2 + $0x80] ss:$16 sps:$4 sm:$0xff]  }
  0x1b   :  { %v2681_v17 = vld [vmem:[#allocation2 + $0x284] ss:$16 sps:$4 sm:$0xff]   ;;  %v2684_v19 = vld [vmem:[#allocation2 + $0x280] ss:$16 sps:$4 sm:$0xff]  }
  0x1c   :  { %1269 = vmatpush1.bf16.msra.mxu1 %v2671_v10  ;;  %v2685_v20 = vld [vmem:[#allocation2 + $0xa4] ss:$16 sps:$4 sm:$0xff]   ;;  %v2689_v22 = vld [vmem:[#allocation2 + $0xa0] ss:$16 sps:$4 sm:$0xff]   ;;  %v50_v10 = vld [vmem:[%s3491_s0 + $0x48] sm:$0xff] }
  0x1d   :  { %1312 = vmatpush1.bf16.msra.mxu0 %v2672_v11  ;;  %1270 = vmatprep.subr.bf16.mxu1 %v2673_v12  ;;  %v2687_v21 = vld [vmem:[#allocation2 + $0x2a4] ss:$16 sps:$4 sm:$0xff]   ;;  %v2690_v23 = vld [vmem:[#allocation2 + $0x2a0] ss:$16 sps:$4 sm:$0xff]   ;;  %v2756_v11 = vld [vmem:[#allocation2 + $0xc] ss:$16 sps:$4 sm:$0xff]  }
  0x1e   :  { %1313 = vmatprep.subr.bf16.mxu0 %v2675_v13  ;;  %v2691_v24 = vld [vmem:[#allocation2 + $0xc4] ss:$16 sps:$4 sm:$0xff]   ;;  %v2695_v26 = vld [vmem:[#allocation2 + $0xc0] ss:$16 sps:$4 sm:$0xff]  }
  0x1f   :  { %v2693_v25 = vld [vmem:[#allocation2 + $0x2c4] ss:$16 sps:$4 sm:$0xff]   ;;  %v2696_v27 = vld [vmem:[#allocation2 + $0x2c0] ss:$16 sps:$4 sm:$0xff]  }
  0x20   :  { %1271 = vmatpush1.bf16.msra.mxu1 %v2677_v14  ;;  %v2697_v28 = vld [vmem:[#allocation2 + $0xe4] ss:$16 sps:$4 sm:$0xff]   ;;  %v2701_v30 = vld [vmem:[#allocation2 + $0xe0] ss:$16 sps:$4 sm:$0xff]   ;;  %v2754_v14 = vld [vmem:[#allocation2 + $0x8] ss:$16 sps:$4 sm:$0xff]  }
  0x21   :  { %1314 = vmatpush1.bf16.msra.mxu0 %v2678_v15  ;;  %1272 = vmatprep.subr.bf16.mxu1 %v2679_v16  ;;  %v2699_v29 = vld [vmem:[#allocation2 + $0x2e4] ss:$16 sps:$4 sm:$0xff]   ;;  %v2702_v31 = vld [vmem:[#allocation2 + $0x2e0] ss:$16 sps:$4 sm:$0xff]  }
  0x22   :  { %1315 = vmatprep.subr.bf16.mxu0 %v2681_v17  ;;  %v2703_v32 = vld [vmem:[#allocation2 + $0x104] ss:$16 sps:$4 sm:$0xff]   ;;  %v2707_v34 = vld [vmem:[#allocation2 + $0x100] ss:$16 sps:$4 sm:$0xff]   ;;  %v2762_v17 = vld [vmem:[#allocation2 + $0x2c] ss:$16 sps:$4 sm:$0xff]  }
  0x23   :  { %v2705_v33 = vld [vmem:[#allocation2 + $0x304] ss:$16 sps:$4 sm:$0xff]   ;;  %v2708_v35 = vld [vmem:[#allocation2 + $0x300] ss:$16 sps:$4 sm:$0xff]  }
  0x24   :  { %1273 = vmatpush1.bf16.msra.mxu1 %v2683_v18  ;;  %v2709_v36 = vld [vmem:[#allocation2 + $0x124] ss:$16 sps:$4 sm:$0xff]   ;;  %v2713_v38 = vld [vmem:[#allocation2 + $0x120] ss:$16 sps:$4 sm:$0xff]  }
  0x25   :  { %1316 = vmatpush1.bf16.msra.mxu0 %v2684_v19  ;;  %1274 = vmatprep.subr.bf16.mxu1 %v2685_v20  ;;  %v2711_v37 = vld [vmem:[#allocation2 + $0x324] ss:$16 sps:$4 sm:$0xff]   ;;  %v2714_v39 = vld [vmem:[#allocation2 + $0x320] ss:$16 sps:$4 sm:$0xff]   ;;  %v2760_v19 = vld [vmem:[#allocation2 + $0x28] ss:$16 sps:$4 sm:$0xff]  }
  0x26   :  { %1317 = vmatprep.subr.bf16.mxu0 %v2687_v21  ;;  %v2715_v40 = vld [vmem:[#allocation2 + $0x144] ss:$16 sps:$4 sm:$0xff]   ;;  %v2719_v42 = vld [vmem:[#allocation2 + $0x140] ss:$16 sps:$4 sm:$0xff]   ;;  %v2768_v21 = vld [vmem:[#allocation2 + $0x4c] ss:$16 sps:$4 sm:$0xff]  }
  0x27   :  { %v2717_v41 = vld [vmem:[#allocation2 + $0x344] ss:$16 sps:$4 sm:$0xff]   ;;  %v2720_v43 = vld [vmem:[#allocation2 + $0x340] ss:$16 sps:$4 sm:$0xff]  }
  0x28   :  { %1275 = vmatpush1.bf16.msra.mxu1 %v2689_v22  ;;  %v2721_v44 = vld [vmem:[#allocation2 + $0x164] ss:$16 sps:$4 sm:$0xff]   ;;  %v2725_v47 = vld [vmem:[#allocation2 + $0x160] ss:$16 sps:$4 sm:$0xff]  }
  0x29   :  { %1318 = vmatpush1.bf16.msra.mxu0 %v2690_v23  ;;  %1276 = vmatprep.subr.bf16.mxu1 %v2691_v24  ;;  %v2723_v45 = vld [vmem:[#allocation2 + $0x364] ss:$16 sps:$4 sm:$0xff]   ;;  %v2726_v48 = vld [vmem:[#allocation2 + $0x360] ss:$16 sps:$4 sm:$0xff]   ;;  %v2766_v23 = vld [vmem:[#allocation2 + $0x48] ss:$16 sps:$4 sm:$0xff]  }
  0x2a   :  { %1319 = vmatprep.subr.bf16.mxu0 %v2693_v25  ;;  %v49_v49 = vld [vmem:[%s3491_s0 + $0x40] sm:$0xff]  ;;  %v51_v52 = vld [vmem:[%s3491_s0 + $0x50] sm:$0xff]  ;;  %v2774_v25 = vld [vmem:[#allocation2 + $0x6c] ss:$16 sps:$4 sm:$0xff]  }
  0x2b   :  { %v3147_v50 = vpack.c.bf16 %v49_v49, %v42_v46  ;;  %v2727_v53 = vld [vmem:[#allocation2 + $0x184] ss:$16 sps:$4 sm:$0xff]   ;;  %v3155_v55 = vpack.c.bf16 %v51_v52, %v44_v51  ;;  %v2731_v56 = vld [vmem:[#allocation2 + $0x180] ss:$16 sps:$4 sm:$0xff]   ;;  %v2796_v46 = vld [vmem:[#allocation2 + $0xe8] ss:$16 sps:$4 sm:$0xff]  }
  0x2c   :  { %1277 = vmatpush1.bf16.msra.mxu1 %v2695_v26  ;;  %v2729_v54 = vld [vmem:[#allocation2 + $0x384] ss:$16 sps:$4 sm:$0xff]   ;;  %v2732_v57 = vld [vmem:[#allocation2 + $0x380] ss:$16 sps:$4 sm:$0xff]   ;;  %v2810_v52 = vld [vmem:[#allocation2 + $0x12c] ss:$16 sps:$4 sm:$0xff]  }
  0x2d   :  { %1320 = vmatpush1.bf16.msra.mxu0 %v2696_v27  ;;  %1278 = vmatprep.subr.bf16.mxu1 %v2697_v28  ;;  %v2733_v58 = vld [vmem:[#allocation2 + $0x1a4] ss:$16 sps:$4 sm:$0xff]   ;;  %v2737_v60 = vld [vmem:[#allocation2 + $0x1a0] ss:$16 sps:$4 sm:$0xff]   ;;  %v2772_v27 = vld [vmem:[#allocation2 + $0x68] ss:$16 sps:$4 sm:$0xff]  }
  0x2e   :  { %1321 = vmatprep.subr.bf16.mxu0 %v2699_v29  ;;  %1296 = vmatprep.mubr.bf16.mxu1 %v3147_v50  ;;  %v2735_v59 = vld [vmem:[#allocation2 + $0x3a4] ss:$16 sps:$4 sm:$0xff]   ;;  %v2738_v61 = vld [vmem:[#allocation2 + $0x3a0] ss:$16 sps:$4 sm:$0xff]   ;;  %v2780_v29 = vld [vmem:[#allocation2 + $0x8c] ss:$16 sps:$4 sm:$0xff]  }
  0x2f   :  { %1339 = vmatprep.mubr.bf16.mxu0 %v3155_v55  ;;  %v2739_v62 = vld [vmem:[#allocation2 + $0x1c4] ss:$16 sps:$4 sm:$0xff]   ;;  %v2743_v0 = vld [vmem:[#allocation2 + $0x1c0] ss:$16 sps:$4 sm:$0xff]  }
  0x30   :  { %1279 = vmatpush1.bf16.msra.mxu1 %v2701_v30  ;;  %v2741_v63 = vld [vmem:[#allocation2 + $0x3c4] ss:$16 sps:$4 sm:$0xff]   ;;  %v2744_v1 = vld [vmem:[#allocation2 + $0x3c0] ss:$16 sps:$4 sm:$0xff]  }
  0x31   :  { %1322 = vmatpush1.bf16.msra.mxu0 %v2702_v31  ;;  %1280 = vmatprep.subr.bf16.mxu1 %v2703_v32  ;;  %v2745_v2 = vld [vmem:[#allocation2 + $0x1e4] ss:$16 sps:$4 sm:$0xff]   ;;  %v2749_v4 = vld [vmem:[#allocation2 + $0x1e0] ss:$16 sps:$4 sm:$0xff]   ;;  %v2778_v31 = vld [vmem:[#allocation2 + $0x88] ss:$16 sps:$4 sm:$0xff]  }
  0x32   :  { %1323 = vmatprep.subr.bf16.mxu0 %v2705_v33  ;;  %v2747_v3 = vld [vmem:[#allocation2 + $0x3e4] ss:$16 sps:$4 sm:$0xff]   ;;  %v2750_v5 = vld [vmem:[#allocation2 + $0x3e0] ss:$16 sps:$4 sm:$0xff]   ;;  %v2786_v33 = vld [vmem:[#allocation2 + $0xac] ss:$16 sps:$4 sm:$0xff]  }
  0x33   :  { %v41_v6 = vld [vmem:[%s3491_s0] sm:$0xff]  ;;  %v43_v9 = vld [vmem:[%s3491_s0 + $0x10] sm:$0xff] }
  0x34   :  { %1281 = vmatpush1.bf16.msra.mxu1 %v2707_v34  ;;  %v2753_v8 = vld [vmem:[#allocation2 + $0x404] ss:$16 sps:$4 sm:$0xff]   ;;  %v3171_v12 = vpack.c.bf16 %v48_v7, %v41_v6  ;;  %v2751_v13 = vld [vmem:[#allocation2 + $0x400] ss:$16 sps:$4 sm:$0xff]   ;;  %v3173_v15 = vpack.c.bf16 %v50_v10, %v43_v9  ;;  %v2832_v7 = vld [vmem:[#allocation2 + $0x1a8] ss:$16 sps:$4 sm:$0xff]  }
  0x35   :  { %1324 = vmatpush1.bf16.msra.mxu0 %v2708_v35  ;;  %1282 = vmatprep.subr.bf16.mxu1 %v2709_v36  ;;  %v2759_v16 = vld [vmem:[#allocation2 + $0x424] ss:$16 sps:$4 sm:$0xff]   ;;  %v2757_v18 = vld [vmem:[#allocation2 + $0x420] ss:$16 sps:$4 sm:$0xff]   ;;  %v2784_v35 = vld [vmem:[#allocation2 + $0xa8] ss:$16 sps:$4 sm:$0xff]  }
  0x36   :  { %1325 = vmatprep.subr.bf16.mxu0 %v2711_v37  ;;  %v2765_v20 = vld [vmem:[#allocation2 + $0x444] ss:$16 sps:$4 sm:$0xff]   ;;  %v2763_v22 = vld [vmem:[#allocation2 + $0x440] ss:$16 sps:$4 sm:$0xff]   ;;  %v2792_v37 = vld [vmem:[#allocation2 + $0xcc] ss:$16 sps:$4 sm:$0xff]  }
  0x37   :  { %v2771_v24 = vld [vmem:[#allocation2 + $0x464] ss:$16 sps:$4 sm:$0xff]   ;;  %v2769_v26 = vld [vmem:[#allocation2 + $0x460] ss:$16 sps:$4 sm:$0xff]   ;;  %v2840_v9 = vld [vmem:[#allocation2 + $0x1cc] ss:$16 sps:$4 sm:$0xff]  }
  0x38   :  { %1283 = vmatpush1.bf16.msra.mxu1 %v2713_v38  ;;  %v2777_v28 = vld [vmem:[#allocation2 + $0x484] ss:$16 sps:$4 sm:$0xff]   ;;  %v2775_v30 = vld [vmem:[#allocation2 + $0x480] ss:$16 sps:$4 sm:$0xff]  }
  0x39   :  { %1326 = vmatpush1.bf16.msra.mxu0 %v2714_v39  ;;  %1284 = vmatprep.subr.bf16.mxu1 %v2715_v40  ;;  %v2783_v32 = vld [vmem:[#allocation2 + $0x4a4] ss:$16 sps:$4 sm:$0xff]   ;;  %v2781_v34 = vld [vmem:[#allocation2 + $0x4a0] ss:$16 sps:$4 sm:$0xff]   ;;  %v2790_v39 = vld [vmem:[#allocation2 + $0xc8] ss:$16 sps:$4 sm:$0xff]  }
  0x3a   :  { %1327 = vmatprep.subr.bf16.mxu0 %v2717_v41  ;;  %v2789_v36 = vld [vmem:[#allocation2 + $0x4c4] ss:$16 sps:$4 sm:$0xff]   ;;  %v2787_v38 = vld [vmem:[#allocation2 + $0x4c0] ss:$16 sps:$4 sm:$0xff]   ;;  %v46_v41 = vld [vmem:[%s3491_s0 + $0x28] sm:$0xff] }
  0x3b   :  { %v2795_v40 = vld [vmem:[#allocation2 + $0x4e4] ss:$16 sps:$4 sm:$0xff]   ;;  %v2799_v49 = vld [vmem:[#allocation2 + $0x500] ss:$16 sps:$4 sm:$0xff]  }
  0x3c   :  { %1285 = vmatpush1.bf16.msra.mxu1 %v2719_v42  ;;  %v53_v42 = vld [vmem:[%s3491_s0 + $0x60] sm:$0xff] }
  0x3d   :  { %1328 = vmatpush1.bf16.msra.mxu0 %v2720_v43  ;;  %1286 = vmatprep.subr.bf16.mxu1 %v2721_v44  ;;  %v2798_v43 = vld [vmem:[#allocation2 + $0xec] ss:$16 sps:$4 sm:$0xff]   ;;  %v3184_v44 = vpack.c.bf16 %v53_v42, %v46_v41  ;;  %v2807_v51 = vld [vmem:[#allocation2 + $0x524] ss:$16 sps:$4 sm:$0xff]   ;;  %v2829_v6 = vld [vmem:[#allocation2 + $0x5a0] ss:$16 sps:$4 sm:$0xff]  }
  0x3e   :  { %1329 = vmatprep.subr.bf16.mxu0 %v2723_v45  ;;  %v2793_v45 = vld [vmem:[#allocation2 + $0x4e0] ss:$16 sps:$4 sm:$0xff]   ;;  %v2873_v41 = vld [vmem:[#allocation2 + $0x2ec] ss:$16 sps:$4 sm:$0xff]  }
  0x3f   :  { %v2835_v10 = vld [vmem:[#allocation2 + $0x5c0] ss:$16 sps:$4 sm:$0xff]  }
  0x40   :  { %1287 = vmatpush1.bf16.msra.mxu1 %v2725_v47  ;;  %v2801_v47 = vld [vmem:[#allocation2 + $0x504] ss:$16 sps:$4 sm:$0xff]   ;;  %v2949_v42 = vld [vmem:[%s3494_s3] ss:$8 sps:$4 sm:$0xff]  }
  0x41   :  { %1330 = vmatpush1.bf16.msra.mxu0 %v2726_v48  ;;  %1288 = vmatprep.subr.bf16.mxu1 %v2727_v53  ;;  %v2804_v48 = vld [vmem:[#allocation2 + $0x10c] ss:$16 sps:$4 sm:$0xff]   ;;  %v2805_v53 = vld [vmem:[#allocation2 + $0x520] ss:$16 sps:$4 sm:$0xff]  }
  0x42   :  { %1331 = vmatprep.subr.bf16.mxu0 %v2729_v54  ;;  %v2808_v54 = vld [vmem:[#allocation2 + $0x128] ss:$16 sps:$4 sm:$0xff]  }
  0x44   :  { %1289 = vmatpush1.bf16.msra.mxu1 %v2731_v56  ;;  %v2813_v56 = vld [vmem:[#allocation2 + $0x544] ss:$16 sps:$4 sm:$0xff]  }
  0x45   :  { %1332 = vmatpush1.bf16.msra.mxu0 %v2732_v57  ;;  %1290 = vmatprep.subr.bf16.mxu1 %v2733_v58  ;;  %v2816_v57 = vld [vmem:[#allocation2 + $0x14c] ss:$16 sps:$4 sm:$0xff]   ;;  %v2811_v58 = vld [vmem:[#allocation2 + $0x540] ss:$16 sps:$4 sm:$0xff]  }
  0x46   :  { %1333 = vmatprep.subr.bf16.mxu0 %v2735_v59  ;;  %v2814_v59 = vld [vmem:[#allocation2 + $0x148] ss:$16 sps:$4 sm:$0xff]  }
  0x48   :  { %1291 = vmatpush1.bf16.msra.mxu1 %v2737_v60  ;;  %v2819_v60 = vld [vmem:[#allocation2 + $0x564] ss:$16 sps:$4 sm:$0xff]  }
  0x49   :  { %1334 = vmatpush1.bf16.msra.mxu0 %v2738_v61  ;;  %1292 = vmatprep.subr.bf16.mxu1 %v2739_v62  ;;  %v2822_v61 = vld [vmem:[#allocation2 + $0x16c] ss:$16 sps:$4 sm:$0xff]   ;;  %v2817_v62 = vld [vmem:[#allocation2 + $0x560] ss:$16 sps:$4 sm:$0xff]  }
  0x4a   :  { %1335 = vmatprep.subr.bf16.mxu0 %v2741_v63  ;;  %v2820_v63 = vld [vmem:[#allocation2 + $0x168] ss:$16 sps:$4 sm:$0xff]  }
  0x4c   :  { %1293 = vmatpush1.bf16.msra.mxu1 %v2743_v0  ;;  %v2825_v0 = vld [vmem:[#allocation2 + $0x584] ss:$16 sps:$4 sm:$0xff]  }
  0x4d   :  { %1336 = vmatpush1.bf16.msra.mxu0 %v2744_v1  ;;  %1294 = vmatprep.subr.bf16.mxu1 %v2745_v2  ;;  %v2828_v1 = vld [vmem:[#allocation2 + $0x18c] ss:$16 sps:$4 sm:$0xff]   ;;  %v2823_v2 = vld [vmem:[#allocation2 + $0x580] ss:$16 sps:$4 sm:$0xff]  }
  0x4e   :  { %1337 = vmatprep.subr.bf16.mxu0 %v2747_v3  ;;  %v2826_v3 = vld [vmem:[#allocation2 + $0x188] ss:$16 sps:$4 sm:$0xff]  }
  0x50   :  { %1295 = vmatpush1.bf16.msra.mxu1 %v2749_v4  ;;  %v2831_v4 = vld [vmem:[#allocation2 + $0x5a4] ss:$16 sps:$4 sm:$0xff]  }
  0x51   :  { %1338 = vmatpush1.bf16.msra.mxu0 %v2750_v5  ;;  %1436 = vmatprep.subr.bf16.mxu1 %v2756_v11  ;;  %v2834_v5 = vld [vmem:[#allocation2 + $0x1ac] ss:$16 sps:$4 sm:$0xff]   ;;  %v2838_v11 = vld [vmem:[#allocation2 + $0x1c8] ss:$16 sps:$4 sm:$0xff]  }
  0x52   :  { %1350 = vmatprep.subr.bf16.mxu0 %v2753_v8  ;;  %v2837_v8 = vld [vmem:[#allocation2 + $0x5c4] ss:$16 sps:$4 sm:$0xff]  }
  0x53   :  { %1297 = vmatmul.mubr.bf16.vlgmr.msra.gmra.mrb[0].mxu1 %v3171_v12 }
  0x54   :  { %1340 = vmatmul.mubr.bf16.vlgmr.msra.gmra.mrb[0].mxu0 %v3173_v15  ;;  %1437 = vmatpush1.bf16.msra.mxu1 %v2754_v14  ;;  %v2846_v14 = vld [vmem:[#allocation2 + $0x1ec] ss:$16 sps:$4 sm:$0xff]  }
  0x55   :  { %1351 = vmatpush1.bf16.msra.mxu0 %v2751_v13  ;;  %1438 = vmatprep.subr.bf16.mxu1 %v2762_v17  ;;  %v2843_v13 = vld [vmem:[#allocation2 + $0x5e4] ss:$16 sps:$4 sm:$0xff]   ;;  %v2844_v17 = vld [vmem:[#allocation2 + $0x1e8] ss:$16 sps:$4 sm:$0xff]  }
  0x56   :  { %1352 = vmatprep.subr.bf16.mxu0 %v2759_v16  ;;  %1468 = vmatprep.mubr.bf16.mxu1 %v3147_v50  ;;  %v2802_v50 = vld [vmem:[#allocation2 + $0x108] ss:$16 sps:$4 sm:$0xff]   ;;  %v2841_v16 = vld [vmem:[#allocation2 + $0x5e0] ss:$16 sps:$4 sm:$0xff]  }
  0x57   :  { %1382 = vmatprep.mubr.bf16.mxu0 %v3184_v44 }
  0x58   :  { %1439 = vmatpush1.bf16.msra.mxu1 %v2760_v19  ;;  %v52_v19 = vld [vmem:[%s3491_s0 + $0x58] sm:$0xff] }
  0x59   :  { %1353 = vmatpush1.bf16.msra.mxu0 %v2757_v18  ;;  %1440 = vmatprep.subr.bf16.mxu1 %v2768_v21  ;;  %v45_v18 = vld [vmem:[%s3491_s0 + $0x20] sm:$0xff] }
  0x5a   :  { %1354 = vmatprep.subr.bf16.mxu0 %v2765_v20  ;;  %v2849_v20 = vld [vmem:[#allocation2 + $0x20c] ss:$16 sps:$4 sm:$0xff]   ;;  %v2855_v21 = vld [vmem:[#allocation2 + $0x604] ss:$16 sps:$4 sm:$0xff]  }
  0x5c   :  { %1441 = vmatpush1.bf16.msra.mxu1 %v2766_v23  ;;  %v2847_v23 = vld [vmem:[#allocation2 + $0x208] ss:$16 sps:$4 sm:$0xff]  }
  0x5d   :  { %1355 = vmatpush1.bf16.msra.mxu0 %v2763_v22  ;;  %1442 = vmatprep.subr.bf16.mxu1 %v2774_v25  ;;  %v3193_v22 = vpack.c.bf16 %v52_v19, %v45_v18  ;;  %v2852_v25 = vld [vmem:[#allocation2 + $0x22c] ss:$16 sps:$4 sm:$0xff]   ;;  %v2976_v19 = vld [vmem:[%s3494_s3 + $0x90] ss:$8 sps:$4 sm:$0xff]  }
  0x5e   :  { %1356 = vmatprep.subr.bf16.mxu0 %v2771_v24  ;;  %v2853_v24 = vld [vmem:[#allocation2 + $0x600] ss:$16 sps:$4 sm:$0xff]   ;;  %v2900_v18 = vld [vmem:[#allocation2 + $0x40c] ss:$16 sps:$4 sm:$0xff]  }
  0x60   :  { %1443 = vmatpush1.bf16.msra.mxu1 %v2772_v27  ;;  %v2858_v27 = vld [vmem:[#allocation2 + $0x24c] ss:$16 sps:$4 sm:$0xff]  }
  0x61   :  { %1357 = vmatpush1.bf16.msra.mxu0 %v2769_v26  ;;  %1444 = vmatprep.subr.bf16.mxu1 %v2780_v29  ;;  %v2850_v26 = vld [vmem:[#allocation2 + $0x228] ss:$16 sps:$4 sm:$0xff]   ;;  %v2945_v29 = vld [vmem:[#allocation2 + $0x60c] ss:$16 sps:$4 sm:$0xff]  }
  0x62   :  { %1358 = vmatprep.subr.bf16.mxu0 %v2777_v28  ;;  %v3088_v28 = vmov 0  }
  0x64   :  { %1445 = vmatpush1.bf16.msra.mxu1 %v2778_v31  ;;  %v47_v31 = vld [vmem:[%s3491_s0 + $0x30] sm:$0xff] }
  0x65   :  { %1359 = vmatpush1.bf16.msra.mxu0 %v2775_v30  ;;  %1446 = vmatprep.subr.bf16.mxu1 %v2786_v33  ;;  %v2856_v30 = vld [vmem:[#allocation2 + $0x248] ss:$16 sps:$4 sm:$0xff]  }
  0x66   :  { %1360 = vmatprep.subr.bf16.mxu0 %v2783_v32  ;;  %v54_v32 = vld [vmem:[%s3491_s0 + $0x68] sm:$0xff] }
  0x67   :  { %v2859_v33 = vld [vmem:[#allocation2 + $0x268] ss:$16 sps:$4 sm:$0xff]  }
  0x68   :  { %1447 = vmatpush1.bf16.msra.mxu1 %v2784_v35  ;;  %v61_v35 = vpack.c.bf16 %v54_v32, %v47_v31  ;;  %v2990_v31 = vld [vmem:[%s3494_s3 + $0xd4] ss:$8 sps:$4 sm:$0xff]   ;;  %v2907_v32 = vld [vmem:[#allocation2 + $0x468] ss:$16 sps:$4 sm:$0xff]  }
  0x69   :  { %1361 = vmatpush1.bf16.msra.mxu0 %v2781_v34  ;;  %1448 = vmatprep.subr.bf16.mxu1 %v2792_v37  ;;  %v2943_v34 = vld [vmem:[#allocation2 + $0x608] ss:$16 sps:$4 sm:$0xff]  }
  0x6a   :  { %1362 = vmatprep.subr.bf16.mxu0 %v2789_v36  ;;  %v2864_v36 = vld [vmem:[#allocation2 + $0x28c] ss:$16 sps:$4 sm:$0xff]   ;;  %v2862_v37 = vld [vmem:[#allocation2 + $0x288] ss:$16 sps:$4 sm:$0xff]  }
  0x6c   :  { %1449 = vmatpush1.bf16.msra.mxu1 %v2790_v39  ;;  %v2870_v39 = vld [vmem:[#allocation2 + $0x2cc] ss:$16 sps:$4 sm:$0xff]  }
  0x6d   :  { %1363 = vmatpush1.bf16.msra.mxu0 %v2787_v38  ;;  %1450 = vmatprep.subr.bf16.mxu1 %v2798_v43  ;;  %v2867_v38 = vld [vmem:[#allocation2 + $0x2ac] ss:$16 sps:$4 sm:$0xff]  }
  0x6e   :  { %1364 = vmatprep.subr.bf16.mxu0 %v2795_v40  ;;  %v2868_v40 = vld [vmem:[#allocation2 + $0x2c8] ss:$16 sps:$4 sm:$0xff]   ;;  %v2951_v43 = vld [vmem:[%s3494_s3 + $0x4] ss:$8 sps:$4 sm:$0xff]  }
  0x70   :  { %1451 = vmatpush1.bf16.msra.mxu1 %v2796_v46  ;;  %v2871_v46 = vld [vmem:[#allocation2 + $0x2e8] ss:$16 sps:$4 sm:$0xff]  }
  0x71   :  { %1365 = vmatpush1.bf16.msra.mxu0 %v2793_v45  ;;  %1452 = vmatprep.subr.bf16.mxu1 %v2804_v48  ;;  %v2954_v45 = vld [vmem:[%s3494_s3 + $0x14] ss:$8 sps:$4 sm:$0xff]   ;;  %v2952_v48 = vld [vmem:[%s3494_s3 + $0x10] ss:$8 sps:$4 sm:$0xff]  }
  0x72   :  { %1366 = vmatprep.subr.bf16.mxu0 %v2801_v47  ;;  %v2876_v47 = vld [vmem:[#allocation2 + $0x30c] ss:$16 sps:$4 sm:$0xff]  }
  0x74   :  { %1453 = vmatpush1.bf16.msra.mxu1 %v2802_v50  ;;  %v2874_v50 = vld [vmem:[#allocation2 + $0x308] ss:$16 sps:$4 sm:$0xff]  }
  0x75   :  { %1367 = vmatpush1.bf16.msra.mxu0 %v2799_v49  ;;  %1454 = vmatprep.subr.bf16.mxu1 %v2810_v52  ;;  %v2957_v49 = vld [vmem:[%s3494_s3 + $0x24] ss:$8 sps:$4 sm:$0xff]   ;;  %v2955_v52 = vld [vmem:[%s3494_s3 + $0x20] ss:$8 sps:$4 sm:$0xff]  }
  0x76   :  { %1368 = vmatprep.subr.bf16.mxu0 %v2807_v51  ;;  %v2879_v51 = vld [vmem:[#allocation2 + $0x32c] ss:$16 sps:$4 sm:$0xff]  }
  0x78   :  { %1455 = vmatpush1.bf16.msra.mxu1 %v2808_v54  ;;  %v2960_v54 = vld [vmem:[%s3494_s3 + $0x34] ss:$8 sps:$4 sm:$0xff]  }
  0x79   :  { %1369 = vmatpush1.bf16.msra.mxu0 %v2805_v53  ;;  %1456 = vmatprep.subr.bf16.mxu1 %v2816_v57  ;;  %v2877_v53 = vld [vmem:[#allocation2 + $0x328] ss:$16 sps:$4 sm:$0xff]  }
  0x7a   :  { %1370 = vmatprep.subr.bf16.mxu0 %v2813_v56  ;;  %v2882_v56 = vld [vmem:[#allocation2 + $0x34c] ss:$16 sps:$4 sm:$0xff]   ;;  %v2958_v57 = vld [vmem:[%s3494_s3 + $0x30] ss:$8 sps:$4 sm:$0xff]  }
  0x7c   :  { %1457 = vmatpush1.bf16.msra.mxu1 %v2814_v59  ;;  %v2880_v59 = vld [vmem:[#allocation2 + $0x348] ss:$16 sps:$4 sm:$0xff]  }
  0x7d   :  { %1371 = vmatpush1.bf16.msra.mxu0 %v2811_v58  ;;  %1458 = vmatprep.subr.bf16.mxu1 %v2822_v61  ;;  %v2963_v58 = vld [vmem:[%s3494_s3 + $0x44] ss:$8 sps:$4 sm:$0xff]   ;;  %v2961_v61 = vld [vmem:[%s3494_s3 + $0x40] ss:$8 sps:$4 sm:$0xff]  }
  0x7e   :  { %1372 = vmatprep.subr.bf16.mxu0 %v2819_v60  ;;  %v2885_v60 = vld [vmem:[#allocation2 + $0x36c] ss:$16 sps:$4 sm:$0xff]  }
  0x80   :  { %1459 = vmatpush1.bf16.msra.mxu1 %v2820_v63  ;;  %v2883_v63 = vld [vmem:[#allocation2 + $0x368] ss:$16 sps:$4 sm:$0xff]  }
  0x81   :  { %1373 = vmatpush1.bf16.msra.mxu0 %v2817_v62  ;;  %1460 = vmatprep.subr.bf16.mxu1 %v2828_v1  ;;  %v2966_v62 = vld [vmem:[%s3494_s3 + $0x54] ss:$8 sps:$4 sm:$0xff]   ;;  %v2964_v1 = vld [vmem:[%s3494_s3 + $0x50] ss:$8 sps:$4 sm:$0xff]  }
  0x82   :  { %1374 = vmatprep.subr.bf16.mxu0 %v2825_v0  ;;  %v2888_v0 = vld [vmem:[#allocation2 + $0x38c] ss:$16 sps:$4 sm:$0xff]  }
  0x84   :  { %1461 = vmatpush1.bf16.msra.mxu1 %v2826_v3  ;;  %v2886_v3 = vld [vmem:[#allocation2 + $0x388] ss:$16 sps:$4 sm:$0xff]  }
  0x85   :  { %1375 = vmatpush1.bf16.msra.mxu0 %v2823_v2  ;;  %1462 = vmatprep.subr.bf16.mxu1 %v2834_v5  ;;  %v2969_v2 = vld [vmem:[%s3494_s3 + $0x64] ss:$8 sps:$4 sm:$0xff]   ;;  %v2967_v5 = vld [vmem:[%s3494_s3 + $0x60] ss:$8 sps:$4 sm:$0xff]  }
  0x86   :  { %1376 = vmatprep.subr.bf16.mxu0 %v2831_v4  ;;  %v2891_v4 = vld [vmem:[#allocation2 + $0x3ac] ss:$16 sps:$4 sm:$0xff]  }
  0x88   :  { %1463 = vmatpush1.bf16.msra.mxu1 %v2832_v7  ;;  %v2889_v7 = vld [vmem:[#allocation2 + $0x3a8] ss:$16 sps:$4 sm:$0xff]  }
  0x89   :  { %1377 = vmatpush1.bf16.msra.mxu0 %v2829_v6  ;;  %1464 = vmatprep.subr.bf16.mxu1 %v2840_v9  ;;  %v2972_v6 = vld [vmem:[%s3494_s3 + $0x74] ss:$8 sps:$4 sm:$0xff]   ;;  %v2970_v9 = vld [vmem:[%s3494_s3 + $0x70] ss:$8 sps:$4 sm:$0xff]  }
  0x8a   :  { %1378 = vmatprep.subr.bf16.mxu0 %v2837_v8  ;;  %v2894_v8 = vld [vmem:[#allocation2 + $0x3cc] ss:$16 sps:$4 sm:$0xff]  }
  0x8c   :  { %1465 = vmatpush1.bf16.msra.mxu1 %v2838_v11  ;;  %v2892_v11 = vld [vmem:[#allocation2 + $0x3c8] ss:$16 sps:$4 sm:$0xff]  }
  0x8d   :  { %1379 = vmatpush1.bf16.msra.mxu0 %v2835_v10  ;;  %1466 = vmatprep.subr.bf16.mxu1 %v2846_v14  ;;  %v2975_v10 = vld [vmem:[%s3494_s3 + $0x84] ss:$8 sps:$4 sm:$0xff]   ;;  %v2973_v14 = vld [vmem:[%s3494_s3 + $0x80] ss:$8 sps:$4 sm:$0xff]  }
  0x8e   :  { %1380 = vmatprep.subr.bf16.mxu0 %v2843_v13  ;;  %v2897_v13 = vld [vmem:[#allocation2 + $0x3ec] ss:$16 sps:$4 sm:$0xff]  }
  0x90   :  { %1467 = vmatpush1.bf16.msra.mxu1 %v2844_v17  ;;  %v2895_v17 = vld [vmem:[#allocation2 + $0x3e8] ss:$16 sps:$4 sm:$0xff]  }
  0x91   :  { %1381 = vmatpush1.bf16.msra.mxu0 %v2841_v16  ;;  %1479 = vmatprep.subr.bf16.mxu1 %v2849_v20  ;;  %v2978_v16 = vld [vmem:[%s3494_s3 + $0x94] ss:$8 sps:$4 sm:$0xff]   ;;  %v2981_v20 = vld [vmem:[%s3494_s3 + $0xa4] ss:$8 sps:$4 sm:$0xff]  }
  0x92   :  { %1393 = vmatprep.subr.bf16.mxu0 %v2855_v21  ;;  %v2898_v21 = vld [vmem:[#allocation2 + $0x408] ss:$16 sps:$4 sm:$0xff]  }
  0x93   :  { %1469 = vmatmul.mubr.bf16.vlgmr.msra.gmra.mrb[4].mxu1 %v3171_v12  ;;  %v2861_v12 = vld [vmem:[#allocation2 + $0x26c] ss:$16 sps:$4 sm:$0xff]  }
  0x94   :  { %1383 = vmatmul.mubr.bf16.vlgmr.msra.gmra.mrb[0].mxu0 %v3193_v22  ;;  %1480 = vmatpush1.bf16.msra.mxu1 %v2847_v23  ;;  %v2903_v23 = vld [vmem:[#allocation2 + $0x42c] ss:$16 sps:$4 sm:$0xff]  }
  0x95   :  { %1394 = vmatpush1.bf16.msra.mxu0 %v2853_v24  ;;  %1481 = vmatprep.subr.bf16.mxu1 %v2852_v25  ;;  %v2979_v24 = vld [vmem:[%s3494_s3 + $0xa0] ss:$8 sps:$4 sm:$0xff]   ;;  %v2984_v25 = vld [vmem:[%s3494_s3 + $0xb4] ss:$8 sps:$4 sm:$0xff]  }
  0x96   :  { %1425 = vmatprep.mubr.bf16.mxu0 %v3088_v28  ;;  %1511 = vmatprep.mubr.bf16.mxu1 %v3155_v55  ;;  %v2865_v55 = vld [vmem:[#allocation2 + $0x2a8] ss:$16 sps:$4 sm:$0xff]  }
  0x97   :  { %1565 = vmatprep.subr.bf16.mxu0 %v2945_v29  ;;  %v2987_v29 = vld [vmem:[%s3494_s3 + $0xc4] ss:$8 sps:$4 sm:$0xff]  }
  0x98   :  { %1482 = vmatpush1.bf16.msra.mxu1 %v2850_v26  ;;  %v2901_v26 = vld [vmem:[#allocation2 + $0x428] ss:$16 sps:$4 sm:$0xff]  }
  0x99   :  { %1483 = vmatprep.subr.bf16.mxu1 %v2858_v27  ;;  %v2906_v27 = vld [vmem:[#allocation2 + $0x44c] ss:$16 sps:$4 sm:$0xff]  }
  0x9c   :  { %1484 = vmatpush1.bf16.msra.mxu1 %v2856_v30  ;;  %v2904_v30 = vld [vmem:[#allocation2 + $0x448] ss:$16 sps:$4 sm:$0xff]  }
  0x9d   :  { %1485 = vmatprep.subr.bf16.mxu1 %v2861_v12  ;;  %v2912_v12 = vld [vmem:[#allocation2 + $0x48c] ss:$16 sps:$4 sm:$0xff]  }
  0xa0   :  { %2497 = vmatmul.mubr.msk.bf16.vlgmr.msra.gmra.mrb[0].mxu0 %vm1260_vm0, %v61_v35  ;;  %1486 = vmatpush1.bf16.msra.mxu1 %v2859_v33  ;;  %v2988_v33 = vld [vmem:[%s3494_s3 + $0xd0] ss:$8 sps:$4 sm:$0xff]  }
  0xa1   :  { %1566 = vmatpush1.bf16.msra.mxu0 %v2943_v34  ;;  %1487 = vmatprep.subr.bf16.mxu1 %v2864_v36  ;;  %v2910_v34 = vld [vmem:[#allocation2 + $0x488] ss:$16 sps:$4 sm:$0xff]  }
  0xa2   :  { %1597 = vmatprep.mubr.bf16.mxu0 %v3088_v28  ;;  %2016 = vmatprep.subr.bf16.mxu0 %v2951_v43  ;;  %v2982_v28 = vld [vmem:[%s3494_s3 + $0xb0] ss:$8 sps:$4 sm:$0xff]   ;;  %v2993_v43 = vld [vmem:[%s3494_s3 + $0xe4] ss:$8 sps:$4 sm:$0xff]  }
  0xa3   :  { %v2913_v36 = vld [vmem:[#allocation2 + $0x4a8] ss:$16 sps:$4 sm:$0xff]  }
  0xa4   :  { %1488 = vmatpush1.bf16.msra.mxu1 %v2862_v37  ;;  %v2918_v37 = vld [vmem:[#allocation2 + $0x4cc] ss:$16 sps:$4 sm:$0xff]  }
  0xa5   :  { %1489 = vmatprep.subr.bf16.mxu1 %v2867_v38  ;;  %v2916_v38 = vld [vmem:[#allocation2 + $0x4c8] ss:$16 sps:$4 sm:$0xff]  }
  0xa8   :  { %2498 = vmatmul.mubr.msk.bf16.vlgmr.msra.gmra.mrb[4].mxu0 %vm1260_vm0, %v61_v35  ;;  %1490 = vmatpush1.bf16.msra.mxu1 %v2865_v55  ;;  %v2915_v35 = vld [vmem:[#allocation2 + $0x4ac] ss:$16 sps:$4 sm:$0xff]  }
  0xa9   :  { %1491 = vmatprep.subr.bf16.mxu1 %v2870_v39  ;;  %2017 = vmatpush1.bf16.msra.mxu0 %v2949_v42  ;;  %v2921_v55 = vld [vmem:[#allocation2 + $0x4ec] ss:$16 sps:$4 sm:$0xff]   ;;  %v2919_v39 = vld [vmem:[#allocation2 + $0x4e8] ss:$16 sps:$4 sm:$0xff]  }
  0xaa   :  { %2018 = vmatprep.subr.bf16.mxu0 %v2954_v45  ;;  %v2927_v42 = vld [vmem:[#allocation2 + $0x52c] ss:$16 sps:$4 sm:$0xff]   ;;  %v2925_v45 = vld [vmem:[#allocation2 + $0x528] ss:$16 sps:$4 sm:$0xff]  }
  0xac   :  { %1492 = vmatpush1.bf16.msra.mxu1 %v2868_v40  ;;  %v2924_v40 = vld [vmem:[#allocation2 + $0x50c] ss:$16 sps:$4 sm:$0xff]  }
  0xad   :  { %1493 = vmatprep.subr.bf16.mxu1 %v2873_v41  ;;  %2019 = vmatpush1.bf16.msra.mxu0 %v2952_v48  ;;  %v2922_v41 = vld [vmem:[#allocation2 + $0x508] ss:$16 sps:$4 sm:$0xff]   ;;  %v2996_v48 = vld [vmem:[%s3494_s3 + $0xf4] ss:$8 sps:$4 sm:$0xff]  }
  0xae   :  { %2020 = vmatprep.subr.bf16.mxu0 %v2957_v49  ;;  %v2928_v49 = vld [vmem:[#allocation2 + $0x548] ss:$16 sps:$4 sm:$0xff]  }
  0xb0   :  { %1494 = vmatpush1.bf16.msra.mxu1 %v2871_v46  ;;  %v2991_v46 = vld [vmem:[%s3494_s3 + $0xe0] ss:$8 sps:$4 sm:$0xff]  }
  0xb1   :  { %1495 = vmatprep.subr.bf16.mxu1 %v2876_v47  ;;  %2021 = vmatpush1.bf16.msra.mxu0 %v2955_v52  ;;  %v2930_v47 = vld [vmem:[#allocation2 + $0x54c] ss:$16 sps:$4 sm:$0xff]   ;;  %v2931_v52 = vld [vmem:[#allocation2 + $0x568] ss:$16 sps:$4 sm:$0xff]  }
  0xb2   :  { %2022 = vmatprep.subr.bf16.mxu0 %v2960_v54  ;;  %v2999_v54 = vld [vmem:[%s3494_s3 + $0x104] ss:$8 sps:$4 sm:$0xff]  }
  0xb4   :  { %1496 = vmatpush1.bf16.msra.mxu1 %v2874_v50  ;;  %v2994_v50 = vld [vmem:[%s3494_s3 + $0xf0] ss:$8 sps:$4 sm:$0xff]  }
  0xb5   :  { %1497 = vmatprep.subr.bf16.mxu1 %v2879_v51  ;;  %2023 = vmatpush1.bf16.msra.mxu0 %v2958_v57  ;;  %v2933_v51 = vld [vmem:[#allocation2 + $0x56c] ss:$16 sps:$4 sm:$0xff]  }
  0xb6   :  { %2024 = vmatprep.subr.bf16.mxu0 %v2963_v58  ;;  %v2939_v57 = vld [vmem:[#allocation2 + $0x5ac] ss:$16 sps:$4 sm:$0xff]   ;;  %v2937_v58 = vld [vmem:[#allocation2 + $0x5a8] ss:$16 sps:$4 sm:$0xff]  }
  0xb8   :  { %1498 = vmatpush1.bf16.msra.mxu1 %v2877_v53  ;;  %v2936_v53 = vld [vmem:[#allocation2 + $0x58c] ss:$16 sps:$4 sm:$0xff]  }
  0xb9   :  { %1499 = vmatprep.subr.bf16.mxu1 %v2882_v56  ;;  %2025 = vmatpush1.bf16.msra.mxu0 %v2961_v61  ;;  %v2934_v56 = vld [vmem:[#allocation2 + $0x588] ss:$16 sps:$4 sm:$0xff]   ;;  %v2948_v61 = vld [vmem:[#allocation2 + $0x5ec] ss:$16 sps:$4 sm:$0xff]  }
  0xba   :  { %2026 = vmatprep.subr.bf16.mxu0 %v2966_v62  ;;  %v2946_v62 = vld [vmem:[#allocation2 + $0x5e8] ss:$16 sps:$4 sm:$0xff]  }
  0xbc   :  { %1500 = vmatpush1.bf16.msra.mxu1 %v2880_v59  ;;  %v2942_v59 = vld [vmem:[#allocation2 + $0x5cc] ss:$16 sps:$4 sm:$0xff]  }
  0xbd   :  { %1501 = vmatprep.subr.bf16.mxu1 %v2885_v60  ;;  %2027 = vmatpush1.bf16.msra.mxu0 %v2964_v1  ;;  %v2940_v60 = vld [vmem:[#allocation2 + $0x5c8] ss:$16 sps:$4 sm:$0xff]  }
  0xbe   :  { %2028 = vmatprep.subr.bf16.mxu0 %v2969_v2 }
  0xc0   :  { %1502 = vmatpush1.bf16.msra.mxu1 %v2883_v63 }
  0xc1   :  { %1503 = vmatprep.subr.bf16.mxu1 %v2888_v0  ;;  %2029 = vmatpush1.bf16.msra.mxu0 %v2967_v5 }
  0xc2   :  { %2030 = vmatprep.subr.bf16.mxu0 %v2972_v6  ;;  %v3312_v6 = vld [vmem:[%s3493_s2] sm:$0xf] }
  0xc4   :  { %1504 = vmatpush1.bf16.msra.mxu1 %v2886_v3  ;;  %v260_v3 = vlaneseq }
  0xc5   :  { %1505 = vmatprep.subr.bf16.mxu1 %v2891_v4  ;;  %2031 = vmatpush1.bf16.msra.mxu0 %v2970_v9 }
  0xc6   :  { %2032 = vmatprep.subr.bf16.mxu0 %v2975_v10  ;;  %v3306_v4 = vshrl.u32 %v260_v3, 7  ;;  %v3033_v3 = vld [vmem:[%s3494_s3 + $0x1c0] ss:$8 sps:$4 sm:$0xff]  }
  0xc8   :  { %1506 = vmatpush1.bf16.msra.mxu1 %v2889_v7  ;;  %v262_v5 = vsub.s32 0, %v3306_v4  ;;  %v266_v7 = vsub.s32 1, %v3306_v4 }
  0xc9   :  { %1507 = vmatprep.subr.bf16.mxu1 %v2894_v8  ;;  %2033 = vmatpush1.bf16.msra.mxu0 %v2973_v14 }
  0xca   :  { %2034 = vmatprep.subr.bf16.mxu0 %v2978_v16  ;;  %v267_v8 = vrot.slane %v3312_v6, %v266_v7 }
  0xcc   :  { %1508 = vmatpush1.bf16.msra.mxu1 %v2892_v11 }
  0xcd   :  { %1509 = vmatprep.subr.bf16.mxu1 %v2897_v13  ;;  %2035 = vmatpush1.bf16.msra.mxu0 %v2976_v19  ;;  %v3047_v19 = vld [vmem:[%s3496_s5 + $0x48] sm:$0xff]  }
  0xce   :  { %2036 = vmatprep.subr.bf16.mxu0 %v2981_v20 }
  0xd0   :  { %1510 = vmatpush1.bf16.msra.mxu1 %v2895_v17  ;;  %v3045_v17 = vld [vmem:[%s3496_s5 + $0x40] sm:$0xff]  }
  0xd1   :  { %1522 = vmatprep.subr.bf16.mxu1 %v2900_v18  ;;  %2037 = vmatpush1.bf16.msra.mxu0 %v2979_v24  ;;  %v3046_v18 = vld [vmem:[%s3496_s5] sm:$0xff]  }
  0xd2   :  { %2038 = vmatprep.subr.bf16.mxu0 %v2984_v25 }
  0xd3   :  { %1512 = vmatmul.mubr.bf16.vlgmr.msra.gmra.mrb[4].mxu1 %v3173_v15  ;;  %v2909_v15 = vld [vmem:[#allocation2 + $0x46c] ss:$16 sps:$4 sm:$0xff]  }
  0xd4   :  { %1523 = vmatpush1.bf16.msra.mxu1 %v2898_v21  ;;  %1554 = vmatprep.mubr.bf16.mxu1 %v3184_v44  ;;  %v2985_v44 = vld [vmem:[%s3494_s3 + $0xc0] ss:$8 sps:$4 sm:$0xff]  }
  0xd5   :  { %1524 = vmatprep.subr.bf16.mxu1 %v2903_v23  ;;  %2039 = vmatpush1.bf16.msra.mxu0 %v2982_v28 }
  0xd6   :  { %2040 = vmatprep.subr.bf16.mxu0 %v2987_v29 }
  0xd8   :  { %1525 = vmatpush1.bf16.msra.mxu1 %v2901_v26 }
  0xd9   :  { %1526 = vmatprep.subr.bf16.mxu1 %v2906_v27  ;;  %2041 = vmatpush1.bf16.msra.mxu0 %v2985_v44  ;;  %v3048_v27 = vld [vmem:[%s3496_s5 + $0x8] sm:$0xff]  }
  0xda   :  { %2042 = vmatprep.subr.bf16.mxu0 %v2990_v31 }
  0xdc   :  { %1527 = vmatpush1.bf16.msra.mxu1 %v2904_v30  ;;  %v3049_v30 = vld [vmem:[%s3496_s5 + $0x50] sm:$0xff]  }
  0xdd   :  { %1528 = vmatprep.subr.bf16.mxu1 %v2909_v15  ;;  %2043 = vmatpush1.bf16.msra.mxu0 %v2988_v33 }
  0xde   :  { %2044 = vmatprep.subr.bf16.mxu0 %v2993_v43  ;;  %v3003_v43 = vld [vmem:[%s3494_s3 + $0x120] ss:$8 sps:$4 sm:$0xff]  }
  0xe0   :  { %1529 = vmatpush1.bf16.msra.mxu1 %v2907_v32 }
  0xe1   :  { %1530 = vmatprep.subr.bf16.mxu1 %v2912_v12  ;;  %2045 = vmatpush1.bf16.msra.mxu0 %v2991_v46  ;;  %v2997_v12 = vld [vmem:[%s3494_s3 + $0x100] ss:$8 sps:$4 sm:$0xff]   ;;  %v3008_v46 = vld [vmem:[%s3494_s3 + $0x134] ss:$8 sps:$4 sm:$0xff]  }
  0xe2   :  { %2046 = vmatprep.subr.bf16.mxu0 %v2996_v48  ;;  %v3006_v48 = vld [vmem:[%s3494_s3 + $0x130] ss:$8 sps:$4 sm:$0xff]  }
  0xe4   :  { %1531 = vmatpush1.bf16.msra.mxu1 %v2910_v34  ;;  %v3050_v34 = vld [vmem:[%s3496_s5 + $0x10] sm:$0xff]  }
  0xe5   :  { %1532 = vmatprep.subr.bf16.mxu1 %v2915_v35  ;;  %2047 = vmatpush1.bf16.msra.mxu0 %v2994_v50  ;;  %v3002_v35 = vld [vmem:[%s3494_s3 + $0x114] ss:$8 sps:$4 sm:$0xff]   ;;  %v3009_v50 = vld [vmem:[%s3494_s3 + $0x140] ss:$8 sps:$4 sm:$0xff]  }
  0xe6   :  { %2059 = vmatprep.subr.bf16.mxu0 %v2999_v54  ;;  %v3015_v54 = vld [vmem:[%s3494_s3 + $0x160] ss:$8 sps:$4 sm:$0xff]  }
  0xe8   :  { %1533 = vmatpush1.bf16.msra.mxu1 %v2913_v36 }
  0xe9   :  { %1534 = vmatprep.subr.bf16.mxu1 %v2918_v37  ;;  %v3051_v37 = vld [vmem:[%s3496_s5 + $0x58] sm:$0xff]  }
  0xec   :  { %1535 = vmatpush1.bf16.msra.mxu1 %v2916_v38 }
  0xed   :  { %1536 = vmatprep.subr.bf16.mxu1 %v2921_v55 }
  0xf0   :  { %1537 = vmatpush1.bf16.msra.mxu1 %v2919_v39  ;;  %v3000_v39 = vld [vmem:[%s3494_s3 + $0x110] ss:$8 sps:$4 sm:$0xff]  }
  0xf1   :  { %1538 = vmatprep.subr.bf16.mxu1 %v2924_v40  ;;  %v3052_v40 = vld [vmem:[%s3496_s5 + $0x18] sm:$0xff]  }
  0xf4   :  { %1539 = vmatpush1.bf16.msra.mxu1 %v2922_v41  ;;  %v3005_v41 = vld [vmem:[%s3494_s3 + $0x124] ss:$8 sps:$4 sm:$0xff]  }
  0xf5   :  { %1540 = vmatprep.subr.bf16.mxu1 %v2927_v42  ;;  %v3053_v42 = vld [vmem:[%s3496_s5 + $0x60] sm:$0xff]  }
  0xf8   :  { %1541 = vmatpush1.bf16.msra.mxu1 %v2925_v45  ;;  %v3054_v45 = vld [vmem:[%s3496_s5 + $0x20] sm:$0xff]  }
  0xf9   :  { %1542 = vmatprep.subr.bf16.mxu1 %v2930_v47  ;;  %v3055_v47 = vld [vmem:[%s3496_s5 + $0x68] sm:$0xff]  }
  0xfc   :  { %1543 = vmatpush1.bf16.msra.mxu1 %v2928_v49  ;;  %v3011_v49 = vld [vmem:[%s3494_s3 + $0x144] ss:$8 sps:$4 sm:$0xff]  }
  0xfd   :  { %1544 = vmatprep.subr.bf16.mxu1 %v2933_v51  ;;  %v3014_v51 = vld [vmem:[%s3494_s3 + $0x154] ss:$8 sps:$4 sm:$0xff]  }
 0x100   :  { %1545 = vmatpush1.bf16.msra.mxu1 %v2931_v52  ;;  %v3012_v52 = vld [vmem:[%s3494_s3 + $0x150] ss:$8 sps:$4 sm:$0xff]  }
 0x101   :  { %1546 = vmatprep.subr.bf16.mxu1 %v2936_v53  ;;  %v3017_v53 = vld [vmem:[%s3494_s3 + $0x164] ss:$8 sps:$4 sm:$0xff]  }
 0x104   :  { %1547 = vmatpush1.bf16.msra.mxu1 %v2934_v56  ;;  %v3020_v56 = vld [vmem:[%s3494_s3 + $0x174] ss:$8 sps:$4 sm:$0xff]  }
 0x105   :  { %1548 = vmatprep.subr.bf16.mxu1 %v2939_v57  ;;  %v3018_v57 = vld [vmem:[%s3494_s3 + $0x170] ss:$8 sps:$4 sm:$0xff]  }
 0x108   :  { %1549 = vmatpush1.bf16.msra.mxu1 %v2937_v58  ;;  %v3023_v58 = vld [vmem:[%s3494_s3 + $0x184] ss:$8 sps:$4 sm:$0xff]  }
 0x109   :  { %1550 = vmatprep.subr.bf16.mxu1 %v2942_v59  ;;  %v3021_v59 = vld [vmem:[%s3494_s3 + $0x180] ss:$8 sps:$4 sm:$0xff]  }
 0x10c   :  { %1551 = vmatpush1.bf16.msra.mxu1 %v2940_v60  ;;  %v3026_v60 = vld [vmem:[%s3494_s3 + $0x194] ss:$8 sps:$4 sm:$0xff]  }
 0x10d   :  { %1552 = vmatprep.subr.bf16.mxu1 %v2948_v61  ;;  %v3024_v61 = vld [vmem:[%s3494_s3 + $0x190] ss:$8 sps:$4 sm:$0xff]  }
 0x110   :  { %1553 = vmatpush1.bf16.msra.mxu1 %v2946_v62  ;;  %v3029_v62 = vld [vmem:[%s3494_s3 + $0x1a4] ss:$8 sps:$4 sm:$0xff]  }
 0x111   :  { %2589 = vmatprep.subr.bf16.mxu1 %v3045_v17 }
 0x113   :  { %1555 = vmatmul.mubr.bf16.vlgmr.msra.gmra.mrb[4].mxu1 %v3193_v22  ;;  %v263_v22 = vrot.slane %v3312_v6, %v262_v5 }
 0x114   :  { %2590 = vmatpush3.bf16.msra.mxu1 %v3046_v18 }
 0x115   :  { %2591 = vmatprep.subr.bf16.mxu1 %v3047_v19 }
 0x118   :  { %2592 = vmatpush3.bf16.msra.mxu1 %v3048_v27 }
 0x119   :  { %2593 = vmatprep.subr.bf16.mxu1 %v3049_v30 }
 0x11c   :  { %2594 = vmatpush3.bf16.msra.mxu1 %v3050_v34 }
 0x11d   :  { %2595 = vmatprep.subr.bf16.mxu1 %v3051_v37  ;;  %v3059_v37 = vld [vmem:[%s3496_s5 + $0x78] sm:$0xff]  }
 0x120   :  { %2596 = vmatpush3.bf16.msra.mxu1 %v3052_v40 }
 0x121   :  { %2597 = vmatprep.subr.bf16.mxu1 %v3053_v42 }
 0x124   :  { %2598 = vmatpush3.bf16.msra.mxu1 %v3054_v45 }
 0x125   :  { %2599 = vmatprep.subr.bf16.mxu1 %v3055_v47 }
 0x126   :  { %v1298_v63 = vpop.f32.mrb[0].mxu1 }
 0x127   :  { %v1300_v0 = vpop.f32.mrb[1].mxu1  ;;  %v1299_v9 = vadd.f32 %v1298_v63, %v263_v22  ;;  %v3027_v63 = vld [vmem:[%s3494_s3 + $0x1a0] ss:$8 sps:$4 sm:$0xff]  }
 0x128   :  { %v1302_v1 = vpop.f32.mrb[2].mxu1  ;;  %v1301_v10 = vadd.f32 %v1300_v0, %v267_v8  ;;  %v3032_v0 = vld [vmem:[%s3494_s3 + $0x1b4] ss:$8 sps:$4 sm:$0xff]  }
 0x129   :  { %v1304_v2 = vpop.f32.mrb[3].mxu1  ;;  %v1303_v13 = vadd.f32 %v1302_v1, %v263_v22  ;;  %v3030_v1 = vld [vmem:[%s3494_s3 + $0x1b0] ss:$8 sps:$4 sm:$0xff]   ;;  %v3038_v22 = vld [vmem:[%s3494_s3 + $0x1d4] ss:$8 sps:$4 sm:$0xff]  }
 0x12a   :  { %v1305_v20 = vadd.f32 %v1304_v2, %v267_v8  ;;  %v3035_v2 = vld [vmem:[%s3494_s3 + $0x1c4] ss:$8 sps:$4 sm:$0xff]   ;;  %v3036_v8 = vld [vmem:[%s3494_s3 + $0x1d0] ss:$8 sps:$4 sm:$0xff]  }
 0x173   :  { %v1427_v11 = vpop.f32.mrb[0].mxu0 }
 0x174   :  { %v2612_v14 = vadd.f32 %v1427_v11, %v1299_v9  ;;  %v1429_v16 = vpop.f32.mrb[1].mxu0  ;;  %v3041_v9 = vld [vmem:[%s3494_s3 + $0x1e4] ss:$8 sps:$4 sm:$0xff]   ;;  %v3044_v11 = vld [vmem:[%s3494_s3 + $0x1f4] ss:$8 sps:$4 sm:$0xff]  }
 0x175   :  { %v2614_v21 = vadd.f32 %v1429_v16, %v1301_v10  ;;  %v1431_v23 = vpop.f32.mrb[2].mxu0  ;;  %v3039_v10 = vld [vmem:[%s3494_s3 + $0x1e0] ss:$8 sps:$4 sm:$0xff]   ;;  %v274_v16 = vsub.s32 3, %v3306_v4 }
 0x176   :  { %v2616_v24 = vadd.f32 %v1431_v23, %v1303_v13  ;;  %v1433_v25 = vpop.f32.mrb[3].mxu0  ;;  %v1608_v28 = vmax.f32 %v2612_v14, 0.0  ;;  %v3042_v13 = vld [vmem:[%s3494_s3 + $0x1f0] ss:$8 sps:$4 sm:$0xff]   ;;  %v270_v14 = vsub.s32 2, %v3306_v4 }
 0x177   :  { %v2618_v26 = vadd.f32 %v1433_v25, %v1305_v20  ;;  %v1609_v15 = vmax.f32 %v2614_v21, 0.0  ;;  %v275_v18 = vrot.slane %v3312_v6, %v274_v16  ;;  %v2563_v4 = vld [vmem:[%s3497_s6] ss:$0 sm:$0xff] }
 0x178   :  { %v1612_v29 = vmax.f32 %v2616_v24, 0.0  ;;  %v271_v17 = vrot.slane %v3312_v6, %v270_v14 }
 0x179   :  { %v1613_v44 = vmax.f32 %v2618_v26, 0.0 }
 0x17a   :  { %v1616_v31 = vpack.c.bf16 %v1612_v29, %v1608_v28 }
 0x17b   :  { %v1617_v32 = vpack.c.bf16 %v1613_v44, %v1609_v15  ;;  %v3339_v33 = vpop.f32.mrb[4].mxu0 }
 0x17c   :  { %v3347_v36 = vpop.f32.mrb[5].mxu0 }
 0x17d   :  { %2048 = vmatprep.mubr.bf16.mxu0 %v1617_v32  ;;  %v3352_v38 = vpop.f32.mrb[6].mxu0 }
 0x17e   :  { %2049 = vmatmul.mubr.bf16.vlgmr.msra.gmra.mrb[8].mxu0 %v1616_v31  ;;  %v3354_v55 = vpop.f32.mrb[7].mxu0 }
 0x17f   :  { %2060 = vmatpush1.bf16.msra.mxu0 %v2997_v12 }
 0x180   :  { %2061 = vmatprep.subr.bf16.mxu0 %v3002_v35  ;;  %v3057_v35 = vld [vmem:[%s3496_s5 + $0x70] sm:$0xff]  }
 0x183   :  { %2062 = vmatpush1.bf16.msra.mxu0 %v3000_v39 }
 0x184   :  { %2063 = vmatprep.subr.bf16.mxu0 %v3005_v41 }
 0x187   :  { %2064 = vmatpush1.bf16.msra.mxu0 %v3003_v43 }
 0x188   :  { %2065 = vmatprep.subr.bf16.mxu0 %v3008_v46 }
 0x18b   :  { %2066 = vmatpush1.bf16.msra.mxu0 %v3006_v48 }
 0x18c   :  { %2067 = vmatprep.subr.bf16.mxu0 %v3011_v49 }
 0x18f   :  { %2068 = vmatpush1.bf16.msra.mxu0 %v3009_v50 }
 0x190   :  { %2069 = vmatprep.subr.bf16.mxu0 %v3014_v51 }
 0x193   :  { %2070 = vmatpush1.bf16.msra.mxu0 %v3012_v52 }
 0x194   :  { %2071 = vmatprep.subr.bf16.mxu0 %v3017_v53 }
 0x197   :  { %2072 = vmatpush1.bf16.msra.mxu0 %v3015_v54 }
 0x198   :  { %2073 = vmatprep.subr.bf16.mxu0 %v3020_v56 }
 0x19b   :  { %2074 = vmatpush1.bf16.msra.mxu0 %v3018_v57 }
 0x19c   :  { %2075 = vmatprep.subr.bf16.mxu0 %v3023_v58 }
 0x19f   :  { %2076 = vmatpush1.bf16.msra.mxu0 %v3021_v59 }
 0x1a0   :  { %2077 = vmatprep.subr.bf16.mxu0 %v3026_v60 }
 0x1a3   :  { %2078 = vmatpush1.bf16.msra.mxu0 %v3024_v61 }
 0x1a4   :  { %2079 = vmatprep.subr.bf16.mxu0 %v3029_v62 }
 0x1a7   :  { %2080 = vmatpush1.bf16.msra.mxu0 %v3027_v63 }
 0x1a8   :  { %2081 = vmatprep.subr.bf16.mxu0 %v3032_v0 }
 0x1ab   :  { %2082 = vmatpush1.bf16.msra.mxu0 %v3030_v1 }
 0x1ac   :  { %2083 = vmatprep.subr.bf16.mxu0 %v3035_v2 }
 0x1af   :  { %2084 = vmatpush1.bf16.msra.mxu0 %v3033_v3 }
 0x1b0   :  { %2085 = vmatprep.subr.bf16.mxu0 %v3038_v22 }
 0x1b3   :  { %2086 = vmatpush1.bf16.msra.mxu0 %v3036_v8 }
 0x1b4   :  { %2087 = vmatprep.subr.bf16.mxu0 %v3041_v9 }
 0x1b7   :  { %2088 = vmatpush1.bf16.msra.mxu0 %v3039_v10 }
 0x1b8   :  { %2089 = vmatprep.subr.bf16.mxu0 %v3044_v11 }
 0x1bb   :  { %2090 = vmatpush1.bf16.msra.mxu0 %v3042_v13 }
 0x1e6   :  { %v1556_v19 = vpop.f32.mrb[4].mxu1 }
 0x1e7   :  { %v2619_v20 = vadd.f32 %v1556_v19, %v271_v17  ;;  %v1558_v21 = vpop.f32.mrb[5].mxu1 }
 0x1e8   :  { %v2621_v23 = vadd.f32 %v1558_v21, %v275_v18  ;;  %v1560_v24 = vpop.f32.mrb[6].mxu1 }
 0x1e9   :  { %v2620_v25 = vadd.f32 %v2619_v20, %v3339_v33  ;;  %v2623_v26 = vadd.f32 %v1560_v24, %v271_v17  ;;  %v1562_v27 = vpop.f32.mrb[7].mxu1  ;;  %v3056_v33 = vld [vmem:[%s3496_s5 + $0x28] sm:$0xff]  }
 0x1ea   :  { %v2622_v28 = vadd.f32 %v2621_v23, %v3347_v36  ;;  %v2625_v29 = vadd.f32 %v1562_v27, %v275_v18  ;;  %2600 = vmatpush3.bf16.msra.mxu1 %v3056_v33  ;;  %v3058_v36 = vld [vmem:[%s3496_s5 + $0x30] sm:$0xff]  }
 0x1eb   :  { %v2624_v30 = vadd.f32 %v2623_v26, %v3352_v38  ;;  %v1610_v44 = vmax.f32 %v2620_v25, 0.0  ;;  %2601 = vmatprep.subr.bf16.mxu1 %v3057_v35  ;;  %v3060_v38 = vld [vmem:[%s3496_s5 + $0x38] sm:$0xff]  }
 0x1ec   :  { %v2626_v15 = vadd.f32 %v2625_v29, %v3354_v55  ;;  %v1611_v32 = vmax.f32 %v2622_v28, 0.0  ;;  %v1684_v55 = vld [vmem:[%s3495_s4] sm:$0x3] }
 0x1ed   :  { %v1614_v31 = vmax.f32 %v2624_v30, 0.0  ;;  %v1689_v39 = vrot.slane %v1684_v55, %v262_v5  ;;  %v1693_v40 = vrot.slane %v1684_v55, %v266_v7 }
 0x1ee   :  { %v1615_v6 = vmax.f32 %v2626_v15, 0.0  ;;  %2602 = vmatpush3.bf16.msra.mxu1 %v3058_v36 }
 0x1ef   :  { %v1618_v12 = vpack.c.bf16 %v1614_v31, %v1610_v44  ;;  %2603 = vmatprep.subr.bf16.mxu1 %v3059_v37 }
 0x1f0   :  { %v1619_v34 = vpack.c.bf16 %v1615_v6, %v1611_v32 }
 0x1f2   :  { %2091 = vmatprep.mubr.bf16.mxu0 %v1619_v34  ;;  %2604 = vmatpush3.bf16.msra.mxu1 %v3060_v38 }
 0x1f3   :  { %2092 = vmatmul.mubr.bf16.vlgmr.msra.gmra.mrb[8].mxu0 %v1618_v12 }
 0x2c6   :  { %v2093_v41 = vpop.f32.mrb[8].mxu0 }
 0x2c7   :  { %v2627_v42 = vadd.f32 %v2093_v41, %v1689_v39  ;;  %v2095_v43 = vpop.f32.mrb[9].mxu0 }
 0x2c8   :  { %v2628_v45 = vadd.f32 %v2095_v43, %v1693_v40  ;;  %v2097_v46 = vpop.f32.mrb[10].mxu0 }
 0x2c9   :  { %v2629_v47 = vadd.f32 %v2097_v46, %v1689_v39  ;;  %v2099_v48 = vpop.f32.mrb[11].mxu0  ;;  %v2102_v50 = vmax.f32 %v2627_v42, 0.0 }
 0x2ca   :  { %v2630_v49 = vadd.f32 %v2099_v48, %v1693_v40  ;;  %v2103_v52 = vmax.f32 %v2628_v45, 0.0 }
 0x2cb   :  { %v2104_v51 = vmax.f32 %v2629_v47, 0.0 }
 0x2cc   :  { %v2105_v53 = vmax.f32 %v2630_v49, 0.0 }
 0x2cd   :  { %v2106_v54 = vpack.c.bf16 %v2104_v51, %v2102_v50 }
 0x2ce   :  { %v2107_v56 = vpack.c.bf16 %v2105_v53, %v2103_v52 }
 0x2d0   :  { %2275 = vmatprep.mubr.bf16.mxu1 %v2107_v56 }
 0x2d1   :  { %2276 = vmatmul.mubr.bf16.vlgmr.msra.gmra.mrb[8].mxu1 %v2106_v54 }
 0x3a4   :  { %v2605_v5 = vpop.f32.mrb[8].mxu1 }
 0x3a5   :  { %v2606_v7 = vpop.f32.mrb[9].mxu1 }
 0x3a6   :  { %v2607_v57 = vadd.f32 %v2606_v7, %v2605_v5  ;;  %v2608_v58 = vpop.f32.mrb[10].mxu1 }
 0x3a7   :  { %v2609_v59 = vpop.f32.mrb[11].mxu1 }
 0x3a8   :  { %v2278_v60 = vadd.f32 %v2607_v57, %v2563_v4  ;;  %v2610_v61 = vadd.f32 %v2609_v59, %v2608_v58 }
 0x3aa   :  { %v2281_v62 = vadd.f32 %v2610_v61, %v2563_v4  ;;  %v2284_v63 = vmax.f32 %v2278_v60, 0.0 }
 0x3ac   :  { %v2285_v0 = vmax.f32 %v2281_v62, 0.0 }
 0x3ae   :  { %v2587_v1 = vpack.c.bf16 %v2285_v0, %v2284_v63 }
 0x3b0   :  { %2588 = vst [vmem:[%s3498_s7] sm:$0xff] %v2587_v1  }
 0x3b1   :  { %2300 = vsyncpa [#allocation3], 1 }

</bundles_post_ra>
